<compile_context>
chip_gen: v7x
topology: tpu7x:2x2x1
jax: 0.10.0
libtpu: 0.0.40
codegen_flags: <defaults>
</compile_context>

<pallas_src>
import functools
import math
import warnings

import numpy as np
import jax
import jax.numpy as jnp
from jax.experimental import pallas as pl
from jax.experimental.pallas import tpu as pltpu

_LANE = 128     # TPU lane width
_KPASS = 128    # MXU K-tile assumed for cost/grouping (v5e-safe; free on v6e/v7x)


# ----------------------------------------------------------------------------
# Small helpers
# ----------------------------------------------------------------------------
def _round_up(a, b):
    return -(-a // b) * b


def _lcm(a, b):
    return a * b // math.gcd(a, b)


def _sublane(dtype):
    # Native sublane packing: f32->8, bf16/f16->16, int8/fp8->32 rows per tile.
    return {1: 32, 2: 16}.get(jnp.dtype(dtype).itemsize, 8)


def _vmem_tile_bytes(rows, cols, dtype):
    it = jnp.dtype(dtype).itemsize
    return (_round_up(max(int(rows), 1), _sublane(dtype))
            * _round_up(max(int(cols), 1), _LANE) * it)


def _lane_bytes(cols, dtype):
    return _round_up(max(int(cols), 1), _LANE) * jnp.dtype(dtype).itemsize


def _vmem_budget():
    """(block-sizing budget, vmem_limit_bytes) -- generation aware."""
    cap = None
    try:
        cap = int(pltpu.get_tpu_info().vmem_capacity_bytes)
    except Exception:
        cap = None
    try:
        kind = jax.devices()[0].device_kind.lower()
    except Exception:
        kind = ""
    if cap is None or cap <= 0:
        if ("v5" in kind) or ("v6" in kind):
            cap = 128 * 1024 * 1024
        else:
            cap = 64 * 1024 * 1024          # conservative default
    if ("v7" in kind) or ("7x" in kind):
        cap = min(cap, 64 * 1024 * 1024)    # 64 MiB per TensorCore on v7x
    return int(cap * 0.60), int(cap * 0.75)


# ----------------------------------------------------------------------------
# Interpolation matrix construction (trace-time, PyTorch F.interpolate semantics)
# ----------------------------------------------------------------------------
def _interp_matrix(in_size, out_size, mode, align_corners):
    """(out_size, in_size) matrix M with y = M @ x (PyTorch semantics)."""
    M = np.zeros((out_size, in_size), dtype=np.float32)
    dst = np.arange(out_size)
    if mode == "nearest":
        src = np.floor(dst * (in_size / out_size)).astype(np.int64)
        src = np.clip(src, 0, in_size - 1)
        M[dst, src] = 1.0
    elif mode in ("bilinear", "linear"):
        if align_corners:
            if out_size > 1:
                src = dst * (in_size - 1) / (out_size - 1)
            else:
                src = np.zeros(out_size, dtype=np.float64)  # PyTorch: index 0
        else:
            src = (dst + 0.5) * (in_size / out_size) - 0.5
            src = np.maximum(src, 0.0)
        i0 = np.clip(np.floor(src).astype(np.int64), 0, in_size - 1)
        i1 = np.minimum(i0 + 1, in_size - 1)
        w = (src - i0).astype(np.float32)
        np.add.at(M, (dst, i0), 1.0 - w)
        np.add.at(M, (dst, i1), w)
    else:
        # TODO(synk): bicubic / trilinear / area modes not implemented.
        raise NotImplementedError(f"mode={mode!r} not supported")
    return M


def _pick_group(H, Hout, align):
    """Planes per in-kernel group: G s.t. G*H and G*Hout are sublane aligned
    and G*H <= 128 (one MXU K-pass on every generation) whenever possible."""
    ga = _lcm(max(1, align // math.gcd(H, align)),
              max(1, align // math.gcd(Hout, align)))
    return ga * max(1, _KPASS // (ga * H))


# ----------------------------------------------------------------------------
# Kernel: one grid step handles B planes flattened to a (B*H, W) block.
# A short scf.for loop walks groups of G planes; per group two MXU matmuls
# (constant cost per plane -> linear in B).
# ----------------------------------------------------------------------------
def _upsample_kernel(x_ref, r_ref, c_ref, o_ref, *,
                     n_groups, gh, ghout, rows_first, compute_dtype):
    r = r_ref[...]                       # (G*Hout, G*H) = kron(I_G, R)
    c = c_ref[...]                       # (W, Wout)
    out_dtype = o_ref.dtype
    round_out = jnp.issubdtype(out_dtype, jnp.integer)
    xa = gh & -gh                        # largest pow2 divisor -> alignment hint
    oa = ghout & -ghout

    @pl.loop(0, n_groups)
    def _(g):
        xi = pl.multiple_of(g * gh, xa)
        oi = pl.multiple_of(g * ghout, oa)
        xg = x_ref[pl.ds(xi, gh), :].astype(compute_dtype)          # (G*H, W)
        if rows_first:
            t = jnp.dot(r, xg, preferred_element_type=jnp.float32)  # (G*Hout, W)
            z = jnp.dot(t.astype(compute_dtype), c,
                        preferred_element_type=jnp.float32)         # (G*Hout, Wout)
        else:
            t = jnp.dot(xg, c, preferred_element_type=jnp.float32)  # (G*H, Wout)
            z = jnp.dot(r, t.astype(compute_dtype),
                        preferred_element_type=jnp.float32)         # (G*Hout, Wout)
        if round_out:
            z = jnp.rint(z)
        o_ref[pl.ds(oi, ghout), :] = z.astype(out_dtype)


# ----------------------------------------------------------------------------
# Wrapper
# ----------------------------------------------------------------------------
def upsample_pallas(x, size=None, scale_factor=None, mode="nearest",
                    align_corners=None):
    if x.ndim != 4:
        raise ValueError("expected NCHW input")
    N, C, H, W = (int(d) for d in x.shape)

    if size is not None:
        if isinstance(size, int):
            Hout = Wout = int(size)
        else:
            Hout, Wout = int(size[0]), int(size[1])
    else:
        if isinstance(scale_factor, (tuple, list)):
            sf_h, sf_w = float(scale_factor[0]), float(scale_factor[1])
        else:
            sf_h = sf_w = float(scale_factor)
        Hout, Wout = int(H * sf_h), int(W * sf_w)

    NC = N * C
    in_dtype = x.dtype

    # Compute dtype: exact bf16 MXU path only for 'nearest' (0/1 weights);
    # bilinear / f16 / int inputs run in f32 so the output is rounded ONCE.
    if in_dtype == jnp.float32:
        compute_dtype = jnp.float32
    elif in_dtype == jnp.bfloat16 and mode == "nearest":
        compute_dtype = jnp.bfloat16
    else:
        compute_dtype = jnp.float32

    R = _interp_matrix(H, Hout, mode, align_corners)        # (Hout, H)
    Cm = _interp_matrix(W, Wout, mode, align_corners).T     # (W, Wout)

    align = _sublane(in_dtype)
    G = _pick_group(H, Hout, align)
    gh, ghout = G * H, G * Hout

    # Matmul order: tile-quantized push-count heuristic (128-wide MXU assumed,
    # safe on v5e; K<=128 is one pass everywhere).  Cols-first wins for
    # upsampling; rows-first only for heavy downsampling.
    kq = lambda k: -(-k // _KPASS)
    nq = lambda n: -(-n // _LANE)
    cols_first_cost = H * kq(W) * nq(Wout) + Hout * kq(gh) * nq(Wout)
    rows_first_cost = Hout * kq(gh) * nq(W) + Hout * kq(W) * nq(Wout)
    rows_first = rows_first_cost < cols_first_cost

    # Plane batch B per grid step: grow until the (lane-padded) VMEM budget
    # binds, but keep >= 2 grid steps when possible (v7x has 2 TensorCores).
    budget, vmem_limit = _vmem_budget()
    per_plane = (2 * H * _lane_bytes(W, in_dtype)        # input block, 2x buffered
                 + 2 * Hout * _lane_bytes(Wout, in_dtype))  # output block, 2x buffered
    weight_bytes = 2 * (_vmem_tile_bytes(ghout, gh, compute_dtype)
                        + _vmem_tile_bytes(W, Wout, compute_dtype))
    avail = max(budget - weight_bytes - (8 << 20), per_plane * G)
    b_fit = max(G, (avail // per_plane) // G * G)
    b_two = max(G, ((NC + 1) // 2) // G * G)
    B = int(max(G, min(b_fit, b_two, _round_up(NC, G))))

    # Pad NC so the flattened fast path always applies (no per-plane fallback).
    NC_pad = _round_up(NC, B)
    x3 = x.reshape(NC, H, W)
    if NC_pad != NC:
        x3 = jnp.concatenate(
            [x3, jnp.zeros((NC_pad - NC, H, W), dtype=in_dtype)], axis=0)
    x2 = x3.reshape(NC_pad * H, W)

    # Group-local block-diagonal row operator (fixed, small: K = G*H <= ~128).
    Rg = np.kron(np.eye(G, dtype=np.float32), R)             # (G*Hout, G*H)
    r_j = jnp.asarray(Rg, dtype=compute_dtype)
    c_j = jnp.asarray(Cm, dtype=compute_dtype)

    n_groups = B // G
    kern = functools.partial(_upsample_kernel, n_groups=n_groups, gh=gh,
                             ghout=ghout, rows_first=rows_first,
                             compute_dtype=compute_dtype)

    itemsize = jnp.dtype(in_dtype).itemsize
    if rows_first:
        flops = 2 * NC_pad * (Hout * H * W + Hout * W * Wout)
    else:
        flops = 2 * NC_pad * (H * W * Wout + Hout * H * Wout)
    cost = pl.CostEstimate(
        flops=flops, transcendentals=0,
        bytes_accessed=NC_pad * (H * W + Hout * Wout) * itemsize)

    out = pl.pallas_call(
        kern,
        out_shape=jax.ShapeDtypeStruct((NC_pad * Hout, Wout), in_dtype),
        grid=(NC_pad // B,),
        in_specs=[
            pl.BlockSpec((B * H, W), lambda i: (i, 0)),
            pl.BlockSpec((ghout, gh), lambda i: (0, 0)),   # grid-invariant
            pl.BlockSpec((W, Wout), lambda i: (0, 0)),     # grid-invariant
        ],
        out_specs=pl.BlockSpec((B * Hout, Wout), lambda i: (i, 0)),
        compiler_params=pltpu.CompilerParams(
            dimension_semantics=("parallel",),
            vmem_limit_bytes=vmem_limit),
        cost_estimate=cost,
    )(x2, r_j, c_j)

    out = out.reshape(NC_pad, Hout, Wout)[:NC].reshape(N, C, Hout, Wout)
    return out


# ----------------------------------------------------------------------------
# Module-like wrapper mirroring PyTorch Upsample.forward / resize semantics
# ----------------------------------------------------------------------------
class Upsample:
    def __init__(self, size=None, scale_factor=None, mode="nearest",
                 align_corners=None):
        self.size = size
        if isinstance(scale_factor, tuple):
            self.scale_factor = tuple(float(f) for f in scale_factor)
        else:
            self.scale_factor = float(scale_factor) if scale_factor else None
        self.mode = mode
        self.align_corners = align_corners

    def __call__(self, x):
        if not self.size:
            sf = self.scale_factor
            if isinstance(sf, tuple):
                size = [int(t * f) for t, f in zip(x.shape[-2:], sf)]
            else:
                size = [int(t * sf) for t in x.shape[-2:]]
        else:
            size = self.size
        # `resize` warning logic from the reference implementation.
        if size is not None and self.align_corners:
            input_h, input_w = (int(d) for d in x.shape[2:])
            output_h, output_w = int(size[0]), int(size[1])
            if output_h > input_h or output_w > output_h:
                if ((output_h > 1 and output_w > 1 and input_h > 1
                     and input_w > 1)
                        and (output_h - 1) % (input_h - 1)
                        and (output_w - 1) % (input_w - 1)):
                    warnings.warn(
                        f"When align_corners={self.align_corners}, the output "
                        f"would more aligned if input size {(input_h, input_w)}"
                        f" is `x+1` and out size {(output_h, output_w)} is "
                        f"`nx+1`")
        return upsample_pallas(x, size=size, mode=self.mode,
                               align_corners=self.align_corners)


if __name__ == "__main__":
    key = jax.random.PRNGKey(0)
    x = jax.random.normal(key, (2, 4, 16, 16), dtype=jnp.float32)

    # 1) nearest, scale_factor=2 (module default mode) -> exact 2x repeat
    y = jax.block_until_ready(Upsample(scale_factor=2.0, mode="nearest")(x))
    assert y.shape == (2, 4, 32, 32), y.shape
    ref = jnp.repeat(jnp.repeat(x, 2, axis=2), 2, axis=3)
    assert jnp.allclose(y, ref), "nearest upsample mismatch"

    # 2) bilinear, align_corners=False, explicit size -> dense einsum reference
    y2 = jax.block_until_ready(
        Upsample(size=(24, 40), mode="bilinear", align_corners=False)(x))
    assert y2.shape == (2, 4, 24, 40), y2.shape
    Rr = jnp.asarray(_interp_matrix(16, 24, "bilinear", False))
    Cc = jnp.asarray(_interp_matrix(16, 40, "bilinear", False))
    ref2 = jnp.einsum("oh,nchw,pw->ncop", Rr, x, Cc)
    assert jnp.allclose(y2, ref2, atol=1e-5, rtol=1e-5), "bilinear mismatch"

    # 3) bilinear, align_corners=True with odd output size
    y3 = jax.block_until_ready(
        Upsample(size=(31, 33), mode="bilinear", align_corners=True)(x))
    assert y3.shape == (2, 4, 31, 33), y3.shape
    Rr3 = jnp.asarray(_interp_matrix(16, 31, "bilinear", True))
    Cc3 = jnp.asarray(_interp_matrix(16, 33, "bilinear", True))
    ref3 = jnp.einsum("oh,nchw,pw->ncop", Rr3, x, Cc3)
    assert jnp.allclose(y3, ref3, atol=1e-5, rtol=1e-5), "align_corners mismatch"

    # 4) bf16 nearest (native-dtype MXU path) -> exact
    xb = x.astype(jnp.bfloat16)
    yb = jax.block_until_ready(Upsample(scale_factor=2.0)(xb))
    refb = jnp.repeat(jnp.repeat(xb, 2, axis=2), 2, axis=3)
    assert yb.dtype == jnp.bfloat16 and jnp.array_equal(yb, refb), "bf16 mismatch"

    # 5) bf16 bilinear (f32 compute, single final rounding)
    y5 = jax.block_until_ready(
        Upsample(size=(32, 32), mode="bilinear", align_corners=False)(xb))
    ref5 = jnp.einsum("oh,nchw,pw->ncop",
                      jnp.asarray(_interp_matrix(16, 32, "bilinear", False)),
                      xb.astype(jnp.float32),
                      jnp.asarray(_interp_matrix(16, 32, "bilinear", False))
                      ).astype(jnp.bfloat16)
    assert jnp.allclose(y5.astype(jnp.float32), ref5.astype(jnp.float32),
                        atol=1e-2, rtol=1e-2), "bf16 bilinear mismatch"

    print("KERNEL_OK")
</pallas_src>

<mosaic_0001>
module attributes {stable_mosaic.version = 11 : i64} {
  func.func @_upsample_kernel(%arg0: i32, %arg1: memref<128x16xf32, #tpu.memory_space<vmem>>, %arg2: memref<256x128xf32, #tpu.memory_space<vmem>>, %arg3: memref<16x32xf32, #tpu.memory_space<vmem>>, %arg4: memref<256x32xf32, #tpu.memory_space<vmem>>) attributes {dimension_semantics = [#tpu.dimension_semantics<parallel>], iteration_bounds = array<i64: 1>, scalar_prefetch = 0 : i64, scratch_operands = 0 : i64, tpu.core_type = #tpu.core_type<tc>, window_params = [{transform_indices = @transform_0, window_bounds = array<i64: 128, 16>}, {pipeline_mode = #tpu.pipeline_mode<synchronous>, transform_indices = @transform_1, window_bounds = array<i64: 256, 128>}, {pipeline_mode = #tpu.pipeline_mode<synchronous>, transform_indices = @transform_2, window_bounds = array<i64: 16, 32>}, {transform_indices = @transform_3, window_bounds = array<i64: 256, 32>}]} {
    %c0 = arith.constant 0 : index
    %c0_0 = arith.constant 0 : index
    %0 = vector.load %arg2[%c0, %c0_0] : memref<256x128xf32, #tpu.memory_space<vmem>>, vector<256x128xf32>
    %c0_1 = arith.constant 0 : index
    %c0_2 = arith.constant 0 : index
    %1 = vector.load %arg3[%c0_1, %c0_2] : memref<16x32xf32, #tpu.memory_space<vmem>>, vector<16x32xf32>
    %c0_i32 = arith.constant 0 : i32
    %c1_i32 = arith.constant 1 : i32
    %2 = arith.muli %c0_i32, %c1_i32 : i32
    %c0_i32_3 = arith.constant 0 : i32
    %3 = arith.addi %c0_i32_3, %2 : i32
    %c128_i32 = arith.constant 128 : i32
    %4 = arith.muli %3, %c128_i32 : i32
    %5 = tpu.assume_multiple %4, 128 : i32
    %c256_i32 = arith.constant 256 : i32
    %6 = arith.muli %3, %c256_i32 : i32
    %7 = tpu.assume_multiple %6, 256 : i32
    %8 = arith.index_cast %5 : i32 to index
    %c0_4 = arith.constant 0 : index
    %9 = vector.load %arg1[%8, %c0_4] : memref<128x16xf32, #tpu.memory_space<vmem>>, vector<128x16xf32>
    %cst = arith.constant dense<0.000000e+00> : vector<128x32xf32>
    %10 = tpu.matmul %9, %1, %cst {dimension_numbers = #tpu.dot_dimension_numbers<[1], [0], [0], [1], [0, 0, 1, 1], [], []>} : vector<128x16xf32>, vector<16x32xf32>, vector<128x32xf32> -> vector<128x32xf32>
    %cst_5 = arith.constant dense<0.000000e+00> : vector<256x32xf32>
    %11 = tpu.matmul %0, %10, %cst_5 {dimension_numbers = #tpu.dot_dimension_numbers<[1], [0], [0], [1], [0, 0, 1, 1], [], []>} : vector<256x128xf32>, vector<128x32xf32>, vector<256x32xf32> -> vector<256x32xf32>
    %12 = arith.index_cast %7 : i32 to index
    %c0_6 = arith.constant 0 : index
    %13 = vector.load %arg4[%12, %c0_6] : memref<256x32xf32, #tpu.memory_space<vmem>>, vector<256x32xf32>
    tpu.vector_store %arg4[%12, %c0_6], %11 {strides = array<i32>} : memref<256x32xf32, #tpu.memory_space<vmem>>, vector<256x32xf32>,
    %c1_i32_7 = arith.constant 1 : i32
    return
  }
  func.func @transform_0(%arg0: i32) -> (i32, i32) {
    %c0_i32 = arith.constant 0 : i32
    %c0_i32_0 = arith.constant 0 : i32
    return %arg0, %c0_i32 : i32, i32
  }
  func.func @transform_1(%arg0: i32) -> (i32, i32) {
    %c0_i32 = arith.constant 0 : i32
    %c0_i32_0 = arith.constant 0 : i32
    %c0_i32_1 = arith.constant 0 : i32
    return %c0_i32, %c0_i32_0 : i32, i32
  }
  func.func @transform_2(%arg0: i32) -> (i32, i32) {
    %c0_i32 = arith.constant 0 : i32
    %c0_i32_0 = arith.constant 0 : i32
    %c0_i32_1 = arith.constant 0 : i32
    return %c0_i32, %c0_i32_0 : i32, i32
  }
  func.func @transform_3(%arg0: i32) -> (i32, i32) {
    %c0_i32 = arith.constant 0 : i32
    %c0_i32_0 = arith.constant 0 : i32
    return %arg0, %c0_i32 : i32, i32
  }
}

</mosaic_0001>

<bundles_post_ra>
// kernel: tpu_custom_call.1
= control target key start
LH: loop header
LB: loop body
LE: loop exit
PB: predicated region body
PF: predicated region fallthrough
CT: control target
= control target key end

     0   :  { %8 = vsyncpa [#allocation3], 0  ;;  %s804_s12 = smov [#allocation2]   ;;  %s1037_s0 = inlined_call_operand.vmem [shape: f32[128,16], index: 0, kind: input, shape index: {}]   ;;  %s1038_s1 = inlined_call_operand.hbm [shape: f32[256,128], index: 1, kind: input, shape index: {}]   ;;  %s1039_s2 = inlined_call_operand.vmem [shape: f32[16,32], index: 2, kind: input, shape index: {}]   ;;  %s1040_s3 = inlined_call_operand.vmem [shape: f32[256,32], index: 3, kind: output, shape index: {}]  }
   0x1   :  { %s16_s13 = sshll.u32 %s804_s12, 4  ;;  %s780_s16 = scalar_lea.hbm %s1038_s1, 4096  ;;  %s17_s13 = int_to_ptr.vmem [resolvable:$true] %s16_s13 }
   0x2   :  { %p781_p0 = scmp.ne.s32.totalorder %s1038_s1, %s780_s16  ;;  %p784_p1 = scmp.lt.u32.totalorder %s780_s16, %s1038_s1 }
   0x4   :  { %p786_p2 = pnand %p784_p1, %p781_p0 }
   0x6   :  { %789 = shalt.err (!%p786_p2)
}
   0x7   :  { %s790_s21 = scalar_lea.vmem %s17_s13, 4096  ;;  %p795_p4 = scmp.lt.s32.totalorder %s17_s13, %s17_s13 }
   0x8   :  { %p791_p3 = scmp.ne.s32.totalorder %s17_s13, %s790_s21  ;;  %p796_p5 = scmp.lt.s32.totalorder %s790_s21, %s790_s21 }
   0xa   :  { %p797_p6 = por %p796_p5, %p795_p4 }
   0xc   :  { %p798_p7 = pnand %p797_p6, %p791_p3 }
   0xe   :  { %801 = shalt.err (!%p798_p7)
}
   0xf   :  { %s805_s22 = smov 128   ;;  %s806_s23 = smov 8  }
  0x10   :  { %22 = dma.hbm_to_vmem [thread:$0]  %s1038_s1, 4096, %s17_s13, [#allocation3], %s805_s22, %s805_s22, %s806_s23  }
  0x11   :  { %802 = dma.done.wait [#allocation3], 4096  }
  0x12   :  { %803 = vsyncadd [#allocation3], 4294963200  ;;  %vm78_vm0 = vcmask 130048   ;;  %v60_v0 = vld [vmem:[%s1039_s2] sm:$0xff]  ;;  %v61_v1 = vld [vmem:[%s1039_s2 + $0x8] sm:$0xff]  ;;  %vm497_vm1 = vcmask 261120  }
  0x13   :  { %v62_v2 = vld [vmem:[%s1037_s0] sm:$0xff]  ;;  %v725_v3 = vpack.c.bf16 %v61_v1, %v60_v0  ;;  %v63_v4 = vld [vmem:[%s1037_s0 + $0x8] sm:$0xff]  ;;  %v64_v5 = vld [vmem:[%s1037_s0 + $0x10] sm:$0xff] }
  0x14   :  { %621 = vmatprep.mubr.msk.f32.mxu0 %vm78_vm0, %v62_v2  ;;  %v65_v6 = vld [vmem:[%s1037_s0 + $0x18] sm:$0xff]  ;;  %v66_v7 = vld [vmem:[%s1037_s0 + $0x20] sm:$0xff]  ;;  %v67_v8 = vld [vmem:[%s1037_s0 + $0x28] sm:$0xff] }
  0x15   :  { %726 = vmatprep.subr.bf16.mxu0 %v725_v3  ;;  %v68_v9 = vld [vmem:[%s1037_s0 + $0x30] sm:$0xff]  ;;  %v69_v10 = vld [vmem:[%s1037_s0 + $0x38] sm:$0xff]  ;;  %v70_v11 = vld [vmem:[%s1037_s0 + $0x40] sm:$0xff] }
  0x16   :  { %728 = vmatpush3.bf16.msra.mxu0 %v725_v3  ;;  %v71_v12 = vld [vmem:[%s1037_s0 + $0x48] sm:$0xff]  ;;  %v72_v13 = vld [vmem:[%s1037_s0 + $0x50] sm:$0xff]  ;;  %v73_v14 = vld [vmem:[%s1037_s0 + $0x58] sm:$0xff] }
  0x17   :  { %v74_v15 = vld [vmem:[%s1037_s0 + $0x60] sm:$0xff]  ;;  %v75_v16 = vld [vmem:[%s1037_s0 + $0x68] sm:$0xff]  ;;  %v76_v17 = vld [vmem:[%s1037_s0 + $0x70] sm:$0xff] }
  0x18   :  { %v77_v18 = vld [vmem:[%s1037_s0 + $0x78] sm:$0xff]  ;;  %v42_v19 = vld [vmem:[#allocation2 + $0x70] sm:$0xff]  ;;  %v28_v20 = vld [vmem:[#allocation2] sm:$0xff] }
  0x19   :  { %622 = vmatmul.mubr.msk.f32.vlgmr.msra.gmra.mrb[0].mxu0 %vm78_vm0, %v63_v4  ;;  %698 = vmatprep.mubr.f32.mxu1 %v42_v19  ;;  %v43_v45 = vld [vmem:[#allocation2 + $0x78] sm:$0xff]  ;;  %v29_v46 = vld [vmem:[#allocation2 + $0x8] sm:$0xff]  ;;  %v44_v47 = vld [vmem:[#allocation2 + $0x80] sm:$0xff] }
  0x1a   :  { %624 = vmatprep.mubr.msk.f32.mxu0 %vm78_vm0, %v64_v5  ;;  %v30_v48 = vld [vmem:[#allocation2 + $0x10] sm:$0xff]  ;;  %v45_v49 = vld [vmem:[#allocation2 + $0x88] sm:$0xff]  ;;  %v31_v50 = vld [vmem:[#allocation2 + $0x18] sm:$0xff] }
  0x1b   :  { %v46_v51 = vld [vmem:[#allocation2 + $0x90] sm:$0xff]  ;;  %v32_v52 = vld [vmem:[#allocation2 + $0x20] sm:$0xff]  ;;  %v47_v53 = vld [vmem:[#allocation2 + $0x98] sm:$0xff] }
  0x1c   :  { %v33_v54 = vld [vmem:[#allocation2 + $0x28] sm:$0xff]  ;;  %v48_v55 = vld [vmem:[#allocation2 + $0xa0] sm:$0xff]  ;;  %v34_v56 = vld [vmem:[#allocation2 + $0x30] sm:$0xff] }
  0x1d   :  { %625 = vmatmul.mubr.msk.f32.gmra.mrb[2].mxu0 %vm78_vm0, %v65_v6  ;;  %v49_v57 = vld [vmem:[#allocation2 + $0xa8] sm:$0xff]  ;;  %v35_v58 = vld [vmem:[#allocation2 + $0x38] sm:$0xff]  ;;  %v50_v59 = vld [vmem:[#allocation2 + $0xb0] sm:$0xff] }
  0x1e   :  { %627 = vmatprep.mubr.msk.f32.mxu0 %vm78_vm0, %v66_v7  ;;  %v36_v60 = vld [vmem:[#allocation2 + $0x40] sm:$0xff]  ;;  %v51_v61 = vld [vmem:[#allocation2 + $0xb8] sm:$0xff]  ;;  %v37_v62 = vld [vmem:[#allocation2 + $0x48] sm:$0xff] }
  0x1f   :  { %v52_v63 = vld [vmem:[#allocation2 + $0xc0] sm:$0xff]  ;;  %v38_v0 = vld [vmem:[#allocation2 + $0x50] sm:$0xff]  ;;  %v53_v1 = vld [vmem:[#allocation2 + $0xc8] sm:$0xff] }
  0x20   :  { %v39_v2 = vld [vmem:[#allocation2 + $0x58] sm:$0xff]  ;;  %v54_v3 = vld [vmem:[#allocation2 + $0xd0] sm:$0xff]  ;;  %v40_v4 = vld [vmem:[#allocation2 + $0x60] sm:$0xff] }
  0x21   :  { %628 = vmatmul.mubr.msk.f32.gmra.mrb[4].mxu0 %vm78_vm0, %v67_v8  ;;  %v55_v5 = vld [vmem:[#allocation2 + $0xd8] sm:$0xff]  ;;  %v41_v6 = vld [vmem:[#allocation2 + $0x68] sm:$0xff]  ;;  %v56_v7 = vld [vmem:[#allocation2 + $0xe0] sm:$0xff] }
  0x22   :  { %630 = vmatprep.mubr.msk.f32.mxu0 %vm78_vm0, %v68_v9  ;;  %v57_v8 = vld [vmem:[#allocation2 + $0xe8] sm:$0xff]  ;;  %v58_v9 = vld [vmem:[#allocation2 + $0xf0] sm:$0xff] }
  0x25   :  { %631 = vmatmul.mubr.msk.f32.gmra.mrb[6].mxu0 %vm78_vm0, %v69_v10  ;;  %v59_v10 = vld [vmem:[#allocation2 + $0xf8] sm:$0xff] }
  0x26   :  { %633 = vmatprep.mubr.msk.f32.mxu0 %vm78_vm0, %v70_v11 }
  0x29   :  { %634 = vmatmul.mubr.msk.f32.gmra.mrb[8].mxu0 %vm78_vm0, %v71_v12 }
  0x2a   :  { %636 = vmatprep.mubr.msk.f32.mxu0 %vm78_vm0, %v72_v13 }
  0x2d   :  { %637 = vmatmul.mubr.msk.f32.gmra.mrb[10].mxu0 %vm78_vm0, %v73_v14 }
  0x2e   :  { %639 = vmatprep.mubr.msk.f32.mxu0 %vm78_vm0, %v74_v15 }
  0x31   :  { %640 = vmatmul.mubr.msk.f32.gmra.mrb[12].mxu0 %vm78_vm0, %v75_v16 }
  0x32   :  { %642 = vmatprep.mubr.msk.f32.mxu0 %vm78_vm0, %v76_v17 }
  0x35   :  { %643 = vmatmul.mubr.msk.f32.gmra.mrb[14].mxu0 %vm78_vm0, %v77_v18 }
  0x36   :  { %677 = vmatprep.mubr.f32.mxu0 %v28_v20 }
  0xec   :  { %v623_v21 = vpop.f32.mrb[0].mxu0 }
  0xed   :  { %v193_v22 = vpop.f32.mrb[1].mxu0 }
  0xee   :  { %v729_v23 = vpack.c.bf16 %v623_v21, %v193_v22 }
  0xf0   :  { %v626_v24 = vpop.f32.mrb[2].mxu0  ;;  %730 = vmatprep.subr.bf16.mxu0 %v729_v23  ;;  %761 = vmatprep.subr.bf16.mxu1 %v729_v23 }
  0xf1   :  { %v203_v25 = vpop.f32.mrb[3].mxu0  ;;  %732 = vmatpush3.bf16.msra.mxu0 %v729_v23  ;;  %769 = vmatpush3.bf16.msra.mxu1 %v729_v23 }
  0xf2   :  { %v733_v26 = vpack.c.bf16 %v626_v24, %v203_v25 }
  0xf4   :  { %v629_v27 = vpop.f32.mrb[4].mxu0  ;;  %734 = vmatprep.subr.bf16.mxu0 %v733_v26  ;;  %762 = vmatprep.subr.bf16.mxu1 %v733_v26 }
  0xf5   :  { %v213_v28 = vpop.f32.mrb[5].mxu0  ;;  %736 = vmatpush3.bf16.msra.mxu0 %v733_v26  ;;  %770 = vmatpush3.bf16.msra.mxu1 %v733_v26 }
  0xf6   :  { %v737_v29 = vpack.c.bf16 %v629_v27, %v213_v28 }
  0xf8   :  { %v632_v30 = vpop.f32.mrb[6].mxu0  ;;  %738 = vmatprep.subr.bf16.mxu0 %v737_v29  ;;  %763 = vmatprep.subr.bf16.mxu1 %v737_v29 }
  0xf9   :  { %v223_v31 = vpop.f32.mrb[7].mxu0  ;;  %740 = vmatpush3.bf16.msra.mxu0 %v737_v29  ;;  %771 = vmatpush3.bf16.msra.mxu1 %v737_v29 }
  0xfa   :  { %v741_v32 = vpack.c.bf16 %v632_v30, %v223_v31 }
  0xfc   :  { %v635_v33 = vpop.f32.mrb[8].mxu0  ;;  %742 = vmatprep.subr.bf16.mxu0 %v741_v32  ;;  %764 = vmatprep.subr.bf16.mxu1 %v741_v32 }
  0xfd   :  { %v233_v34 = vpop.f32.mrb[9].mxu0  ;;  %744 = vmatpush3.bf16.msra.mxu0 %v741_v32  ;;  %772 = vmatpush3.bf16.msra.mxu1 %v741_v32 }
  0xfe   :  { %v745_v35 = vpack.c.bf16 %v635_v33, %v233_v34 }
 0x100   :  { %v638_v36 = vpop.f32.mrb[10].mxu0  ;;  %746 = vmatprep.subr.bf16.mxu0 %v745_v35  ;;  %765 = vmatprep.subr.bf16.mxu1 %v745_v35 }
 0x101   :  { %v243_v37 = vpop.f32.mrb[11].mxu0  ;;  %748 = vmatpush3.bf16.msra.mxu0 %v745_v35  ;;  %773 = vmatpush3.bf16.msra.mxu1 %v745_v35 }
 0x102   :  { %v749_v38 = vpack.c.bf16 %v638_v36, %v243_v37 }
 0x104   :  { %v641_v39 = vpop.f32.mrb[12].mxu0  ;;  %750 = vmatprep.subr.bf16.mxu0 %v749_v38  ;;  %766 = vmatprep.subr.bf16.mxu1 %v749_v38 }
 0x105   :  { %v253_v40 = vpop.f32.mrb[13].mxu0  ;;  %752 = vmatpush3.bf16.msra.mxu0 %v749_v38  ;;  %774 = vmatpush3.bf16.msra.mxu1 %v749_v38 }
 0x106   :  { %v753_v41 = vpack.c.bf16 %v641_v39, %v253_v40 }
 0x108   :  { %v644_v42 = vpop.f32.mrb[14].mxu0  ;;  %754 = vmatprep.subr.bf16.mxu0 %v753_v41  ;;  %767 = vmatprep.subr.bf16.mxu1 %v753_v41 }
 0x109   :  { %v263_v43 = vpop.f32.mrb[15].mxu0  ;;  %756 = vmatpush3.bf16.msra.mxu0 %v753_v41  ;;  %775 = vmatpush3.bf16.msra.mxu1 %v753_v41 }
 0x10a   :  { %v757_v44 = vpack.c.bf16 %v644_v42, %v263_v43 }
 0x10c   :  { %758 = vmatprep.subr.bf16.mxu0 %v757_v44  ;;  %768 = vmatprep.subr.bf16.mxu1 %v757_v44 }
 0x10d   :  { %760 = vmatpush3.bf16.msra.mxu0 %v757_v44  ;;  %776 = vmatpush3.bf16.msra.mxu1 %v757_v44 }
 0x110   :  { %699 = vmatmul.mubr.f32.vlgmr.msra.gmra.mrb[0].mxu1 %v43_v45  ;;  %678 = vmatmul.mubr.f32.vlgmr.msra.gmra.mrb[16].mxu0 %v29_v46 }
 0x111   :  { %701 = vmatprep.mubr.f32.mxu1 %v44_v47  ;;  %680 = vmatprep.mubr.f32.mxu0 %v30_v48 }
 0x114   :  { %702 = vmatmul.mubr.f32.gmra.mrb[2].mxu1 %v45_v49  ;;  %681 = vmatmul.mubr.f32.gmra.mrb[18].mxu0 %v31_v50 }
 0x115   :  { %704 = vmatprep.mubr.f32.mxu1 %v46_v51  ;;  %683 = vmatprep.mubr.f32.mxu0 %v32_v52 }
 0x118   :  { %705 = vmatmul.mubr.f32.gmra.mrb[4].mxu1 %v47_v53  ;;  %684 = vmatmul.mubr.f32.gmra.mrb[20].mxu0 %v33_v54 }
 0x119   :  { %707 = vmatprep.mubr.f32.mxu1 %v48_v55  ;;  %686 = vmatprep.mubr.f32.mxu0 %v34_v56 }
 0x11c   :  { %708 = vmatmul.mubr.f32.gmra.mrb[6].mxu1 %v49_v57  ;;  %687 = vmatmul.mubr.f32.gmra.mrb[22].mxu0 %v35_v58 }
 0x11d   :  { %710 = vmatprep.mubr.f32.mxu1 %v50_v59  ;;  %689 = vmatprep.mubr.f32.mxu0 %v36_v60 }
 0x120   :  { %711 = vmatmul.mubr.f32.gmra.mrb[8].mxu1 %v51_v61  ;;  %690 = vmatmul.mubr.f32.gmra.mrb[24].mxu0 %v37_v62 }
 0x121   :  { %713 = vmatprep.mubr.f32.mxu1 %v52_v63  ;;  %692 = vmatprep.mubr.f32.mxu0 %v38_v0 }
 0x124   :  { %714 = vmatmul.mubr.f32.gmra.mrb[10].mxu1 %v53_v1  ;;  %693 = vmatmul.mubr.f32.gmra.mrb[26].mxu0 %v39_v2 }
 0x125   :  { %716 = vmatprep.mubr.f32.mxu1 %v54_v3  ;;  %695 = vmatprep.mubr.f32.mxu0 %v40_v4 }
 0x128   :  { %717 = vmatmul.mubr.f32.gmra.mrb[12].mxu1 %v55_v5  ;;  %696 = vmatmul.mubr.f32.gmra.mrb[28].mxu0 %v41_v6 }
 0x129   :  { %719 = vmatprep.mubr.f32.mxu1 %v56_v7 }
 0x12c   :  { %720 = vmatmul.mubr.f32.gmra.mrb[14].mxu1 %v57_v8 }
 0x12d   :  { %722 = vmatprep.mubr.f32.mxu1 %v58_v9 }
 0x130   :  { %723 = vmatmul.mubr.f32.gmra.mrb[16].mxu1 %v59_v10 }
 0x1e3   :  { %v700_v11 = vpop.f32.mrb[0].mxu1  ;;  %v679_v12 = vpop.f32.mrb[16].mxu0 }
 0x1e4   :  { %513 = vst.msk [vmem:[%s1040_s3 + $0x78] sm:$0xff] %vm497_vm1, %v700_v11  ;;  %v408_v13 = vpop.f32.mrb[1].mxu1  ;;  %499 = vst.msk [vmem:[%s1040_s3 + $0x8] sm:$0xff] %vm497_vm1, %v679_v12  ;;  %v338_v14 = vpop.f32.mrb[17].mxu0 }
 0x1e5   :  { %512 = vst.msk [vmem:[%s1040_s3 + $0x70] sm:$0xff] %vm497_vm1, %v408_v13  ;;  %498 = vst.msk [vmem:[%s1040_s3] sm:$0xff] %vm497_vm1, %v338_v14 }
 0x1e7   :  { %v703_v15 = vpop.f32.mrb[2].mxu1  ;;  %v682_v16 = vpop.f32.mrb[18].mxu0 }
 0x1e8   :  { %515 = vst.msk [vmem:[%s1040_s3 + $0x88] sm:$0xff] %vm497_vm1, %v703_v15  ;;  %v418_v17 = vpop.f32.mrb[3].mxu1  ;;  %501 = vst.msk [vmem:[%s1040_s3 + $0x18] sm:$0xff] %vm497_vm1, %v682_v16  ;;  %v348_v18 = vpop.f32.mrb[19].mxu0 }
 0x1e9   :  { %514 = vst.msk [vmem:[%s1040_s3 + $0x80] sm:$0xff] %vm497_vm1, %v418_v17  ;;  %500 = vst.msk [vmem:[%s1040_s3 + $0x10] sm:$0xff] %vm497_vm1, %v348_v18 }
 0x1eb   :  { %v706_v19 = vpop.f32.mrb[4].mxu1  ;;  %v685_v20 = vpop.f32.mrb[20].mxu0 }
 0x1ec   :  { %517 = vst.msk [vmem:[%s1040_s3 + $0x98] sm:$0xff] %vm497_vm1, %v706_v19  ;;  %v428_v21 = vpop.f32.mrb[5].mxu1  ;;  %503 = vst.msk [vmem:[%s1040_s3 + $0x28] sm:$0xff] %vm497_vm1, %v685_v20  ;;  %v358_v22 = vpop.f32.mrb[21].mxu0 }
 0x1ed   :  { %516 = vst.msk [vmem:[%s1040_s3 + $0x90] sm:$0xff] %vm497_vm1, %v428_v21  ;;  %502 = vst.msk [vmem:[%s1040_s3 + $0x20] sm:$0xff] %vm497_vm1, %v358_v22 }
 0x1ef   :  { %v709_v23 = vpop.f32.mrb[6].mxu1  ;;  %v688_v24 = vpop.f32.mrb[22].mxu0 }
 0x1f0   :  { %519 = vst.msk [vmem:[%s1040_s3 + $0xa8] sm:$0xff] %vm497_vm1, %v709_v23  ;;  %v438_v25 = vpop.f32.mrb[7].mxu1  ;;  %505 = vst.msk [vmem:[%s1040_s3 + $0x38] sm:$0xff] %vm497_vm1, %v688_v24  ;;  %v368_v26 = vpop.f32.mrb[23].mxu0 }
 0x1f1   :  { %518 = vst.msk [vmem:[%s1040_s3 + $0xa0] sm:$0xff] %vm497_vm1, %v438_v25  ;;  %504 = vst.msk [vmem:[%s1040_s3 + $0x30] sm:$0xff] %vm497_vm1, %v368_v26 }
 0x1f3   :  { %v712_v27 = vpop.f32.mrb[8].mxu1  ;;  %v691_v28 = vpop.f32.mrb[24].mxu0 }
 0x1f4   :  { %521 = vst.msk [vmem:[%s1040_s3 + $0xb8] sm:$0xff] %vm497_vm1, %v712_v27  ;;  %v448_v29 = vpop.f32.mrb[9].mxu1  ;;  %507 = vst.msk [vmem:[%s1040_s3 + $0x48] sm:$0xff] %vm497_vm1, %v691_v28  ;;  %v378_v30 = vpop.f32.mrb[25].mxu0 }
 0x1f5   :  { %520 = vst.msk [vmem:[%s1040_s3 + $0xb0] sm:$0xff] %vm497_vm1, %v448_v29  ;;  %506 = vst.msk [vmem:[%s1040_s3 + $0x40] sm:$0xff] %vm497_vm1, %v378_v30 }
 0x1f7   :  { %v715_v31 = vpop.f32.mrb[10].mxu1  ;;  %v694_v32 = vpop.f32.mrb[26].mxu0 }
 0x1f8   :  { %523 = vst.msk [vmem:[%s1040_s3 + $0xc8] sm:$0xff] %vm497_vm1, %v715_v31  ;;  %v458_v33 = vpop.f32.mrb[11].mxu1  ;;  %509 = vst.msk [vmem:[%s1040_s3 + $0x58] sm:$0xff] %vm497_vm1, %v694_v32  ;;  %v388_v34 = vpop.f32.mrb[27].mxu0 }
 0x1f9   :  { %522 = vst.msk [vmem:[%s1040_s3 + $0xc0] sm:$0xff] %vm497_vm1, %v458_v33  ;;  %508 = vst.msk [vmem:[%s1040_s3 + $0x50] sm:$0xff] %vm497_vm1, %v388_v34 }
 0x1fb   :  { %v718_v35 = vpop.f32.mrb[12].mxu1  ;;  %v697_v36 = vpop.f32.mrb[28].mxu0 }
 0x1fc   :  { %525 = vst.msk [vmem:[%s1040_s3 + $0xd8] sm:$0xff] %vm497_vm1, %v718_v35  ;;  %v468_v37 = vpop.f32.mrb[13].mxu1  ;;  %511 = vst.msk [vmem:[%s1040_s3 + $0x68] sm:$0xff] %vm497_vm1, %v697_v36  ;;  %v398_v38 = vpop.f32.mrb[29].mxu0 }
 0x1fd   :  { %524 = vst.msk [vmem:[%s1040_s3 + $0xd0] sm:$0xff] %vm497_vm1, %v468_v37  ;;  %510 = vst.msk [vmem:[%s1040_s3 + $0x60] sm:$0xff] %vm497_vm1, %v398_v38 }
 0x1ff   :  { %v721_v39 = vpop.f32.mrb[14].mxu1 }
 0x200   :  { %527 = vst.msk [vmem:[%s1040_s3 + $0xe8] sm:$0xff] %vm497_vm1, %v721_v39  ;;  %v478_v40 = vpop.f32.mrb[15].mxu1 }
 0x201   :  { %526 = vst.msk [vmem:[%s1040_s3 + $0xe0] sm:$0xff] %vm497_vm1, %v478_v40 }
 0x203   :  { %v724_v41 = vpop.f32.mrb[16].mxu1 }
 0x204   :  { %529 = vst.msk [vmem:[%s1040_s3 + $0xf8] sm:$0xff] %vm497_vm1, %v724_v41  ;;  %v488_v42 = vpop.f32.mrb[17].mxu1 }
 0x205   :  { %528 = vst.msk [vmem:[%s1040_s3 + $0xf0] sm:$0xff] %vm497_vm1, %v488_v42 }
 0x206   :  { %534 = vsyncpa [#allocation3], 1 }

</bundles_post_ra>
